<compile_context>
chip_gen: v5e
topology: v5e:2x2
jax: 0.10.0
libtpu: 0.0.40
codegen_flags: <defaults>
</compile_context>

<pallas_src>
import math

import jax
import jax.numpy as jnp
from jax.experimental import pallas as pl
from jax.experimental.pallas import tpu as pltpu


# ----------------------------------------------------------------------------
# Kernels
# ----------------------------------------------------------------------------

def _lfft_whole_kernel(a_ref, b_ref, wr_ref, wi_ref, r_ref, i_ref):
    """Single-block path: all operands resident in VMEM, 4 MXU matmuls,
    complex combination in-kernel, two lane-dense f32 stores."""
    a = a_ref[...]
    b = b_ref[...]
    wr = wr_ref[...]
    wi = wi_ref[...]
    ar = jnp.dot(a, wr, preferred_element_type=jnp.float32)
    bi = jnp.dot(b, wi, preferred_element_type=jnp.float32)
    ai = jnp.dot(a, wi, preferred_element_type=jnp.float32)
    br = jnp.dot(b, wr, preferred_element_type=jnp.float32)
    r_ref[...] = ar - bi
    i_ref[...] = ai + br


def _lfft_tiled_kernel(a_ref, b_ref, wr_ref, wi_ref, r_ref, i_ref):
    """Tiled path: accumulate directly into the resident f32 output tiles
    (output block index is constant over the k axis)."""
    k = pl.program_id(2)

    @pl.when(k == 0)
    def _():
        r_ref[...] = jnp.zeros_like(r_ref)
        i_ref[...] = jnp.zeros_like(i_ref)

    a = a_ref[...]
    b = b_ref[...]
    wr = wr_ref[...]
    wi = wi_ref[...]
    r_ref[...] += (jnp.dot(a, wr, preferred_element_type=jnp.float32)
                   - jnp.dot(b, wi, preferred_element_type=jnp.float32))
    i_ref[...] += (jnp.dot(a, wi, preferred_element_type=jnp.float32)
                   + jnp.dot(b, wr, preferred_element_type=jnp.float32))


# ----------------------------------------------------------------------------
# Wrapper
# ----------------------------------------------------------------------------

# Keep the grid-less path for genuinely small problems only (launch/DMA bound);
# medium/large problems go to the tiled, megacore-parallel path.
_SINGLE_BLOCK_BYTES = 4 * 1024 * 1024


def _best_tile(dim, cap, align):
    """Largest tile <= cap that divides `dim` and is a multiple of `align`.
    Falls back to the full dim (no tiling on that axis) if none exists."""
    if dim <= cap:
        return dim
    t = (cap // align) * align
    while t >= align:
        if dim % t == 0:
            return t
        t -= align
    return dim


def _lfft_matmuls(a, b, wr, wi):
    """Returns (r, i) = (a@wr - b@wi, a@wi + b@wr) as f32 via Pallas."""
    M, K = a.shape
    _, N = wr.shape
    isz = jnp.dtype(a.dtype).itemsize

    flops = 8 * M * K * N                                   # 4 matmuls
    bytes_accessed = (2 * M * K + 2 * K * N) * isz + 2 * M * N * 4
    cost = pl.CostEstimate(flops=flops, transcendentals=0,
                           bytes_accessed=bytes_accessed)
    out_shape = (jax.ShapeDtypeStruct((M, N), jnp.float32),
                 jax.ShapeDtypeStruct((M, N), jnp.float32))

    footprint = bytes_accessed
    if footprint <= _SINGLE_BLOCK_BYTES:
        # No grid: one matmul burst, everything resident, lane-dense stores.
        # 2x footprint budget in case Pallas still double-buffers the implicit
        # whole-array blocks (keeps v5e's 16 MiB scoped default safe).
        vmem_bytes = 2 * footprint + (1 << 20)
        return pl.pallas_call(
            _lfft_whole_kernel,
            out_shape=out_shape,
            cost_estimate=cost,
            compiler_params=pltpu.CompilerParams(vmem_limit_bytes=vmem_bytes),
        )(a, b, wr, wi)

    # ---- Tiled fallback for big problems ------------------------------------
    # Skinny-M friendly tiles: small M tile, big (>= multi-MiB) weight tiles so
    # each grid step's DMA dwarfs the ~0.35 us per-step fixed cost.
    tm = _best_tile(M, 256, 8)
    tk = _best_tile(K, 1024, 128)
    tn = _best_tile(N, 1024, 128)

    # Explicit VMEM budget: double-buffered a/b/wr/wi tiles + f32 output tiles.
    vmem_bytes = (2 * (2 * tm * tk * isz + 2 * tk * tn * isz)
                  + 2 * 2 * tm * tn * 4 + (2 << 20))
    vmem_bytes = min(vmem_bytes, 48 * 1024 * 1024)          # v7x-safe ceiling

    return pl.pallas_call(
        _lfft_tiled_kernel,
        out_shape=out_shape,
        grid_spec=pltpu.PrefetchScalarGridSpec(
            num_scalar_prefetch=0,
            grid=(M // tm, N // tn, K // tk),               # reduction last
            in_specs=[pl.BlockSpec((tm, tk), lambda i, j, k: (i, k)),
                      pl.BlockSpec((tm, tk), lambda i, j, k: (i, k)),
                      pl.BlockSpec((tk, tn), lambda i, j, k: (k, j)),
                      pl.BlockSpec((tk, tn), lambda i, j, k: (k, j))],
            out_specs=[pl.BlockSpec((tm, tn), lambda i, j, k: (i, j)),
                       pl.BlockSpec((tm, tn), lambda i, j, k: (i, j))],
        ),
        cost_estimate=cost,
        compiler_params=pltpu.CompilerParams(
            dimension_semantics=("parallel", "parallel", "arbitrary"),
            vmem_limit_bytes=vmem_bytes),
    )(a, b, wr, wi)


def learnable_fft(real_input, imag_input, w_real, w_imag,
                  compute_dtype=jnp.bfloat16):
    """Pallas equivalent of LearnableFFT.forward. Returns f32 [B, output_len, 2]."""
    B, K = real_input.shape
    K2, N = w_real.shape
    assert K == K2 and w_imag.shape == (K, N)
    assert imag_input.shape == (B, K)

    # bf16 operands, f32 accumulation / outputs.
    a = real_input.astype(compute_dtype)
    b = imag_input.astype(compute_dtype)
    wr = w_real.astype(compute_dtype)
    wi = w_imag.astype(compute_dtype)

    r_part, i_part = _lfft_matmuls(a, b, wr, wi)

    # Module spec mandates the trailing size-2 complex axis -> wrapper glue.
    return jnp.stack([r_part, i_part], axis=-1)


# ----------------------------------------------------------------------------
# Self-test
# ----------------------------------------------------------------------------

if __name__ == "__main__":
    # Shapes consistent with the module: batch=8, input_len=256, output_len=128.
    B, INPUT_LEN, OUTPUT_LEN = 8, 256, 128

    key = jax.random.PRNGKey(0)
    k_wr, k_wi, k_xr, k_xi = jax.random.split(key, 4)

    # Deterministic parameter init mirroring torch.randn(...) / sqrt(input_len).
    w_real = jax.random.normal(k_wr, (INPUT_LEN, OUTPUT_LEN), jnp.float32) / math.sqrt(INPUT_LEN)
    w_imag = jax.random.normal(k_wi, (INPUT_LEN, OUTPUT_LEN), jnp.float32) / math.sqrt(INPUT_LEN)

    real_input = jax.random.normal(k_xr, (B, INPUT_LEN), jnp.float32)
    imag_input = jax.random.normal(k_xi, (B, INPUT_LEN), jnp.float32)

    fn = jax.jit(learnable_fft)
    out = jax.block_until_ready(fn(real_input, imag_input, w_real, w_imag))
    assert out.shape == (B, OUTPUT_LEN, 2)

    # Matched-precision reference (bf16 operands, f32 accumulation) -> tight check.
    a16, b16 = real_input.astype(jnp.bfloat16), imag_input.astype(jnp.bfloat16)
    wr16, wi16 = w_real.astype(jnp.bfloat16), w_imag.astype(jnp.bfloat16)
    r_ref = (jnp.dot(a16, wr16, preferred_element_type=jnp.float32)
             - jnp.dot(b16, wi16, preferred_element_type=jnp.float32))
    i_ref = (jnp.dot(a16, wi16, preferred_element_type=jnp.float32)
             + jnp.dot(b16, wr16, preferred_element_type=jnp.float32))
    ref16 = jnp.stack([r_ref, i_ref], axis=-1)
    assert jnp.allclose(out, ref16, atol=1e-2, rtol=1e-2)

    # Loose check vs. the full-f32 PyTorch-equivalent reference (bf16 rounding).
    r32 = real_input @ w_real - imag_input @ w_imag
    i32 = real_input @ w_imag + imag_input @ w_real
    ref32 = jnp.stack([r32, i32], axis=-1)
    assert jnp.allclose(out, ref32, atol=1e-1, rtol=1e-1)

    print("KERNEL_OK")
</pallas_src>

<mosaic_0001>
module attributes {stable_mosaic.version = 11 : i64} {
  func.func @_lfft_whole_kernel(%arg0: memref<8x256xbf16, #tpu.memory_space<vmem>>, %arg1: memref<8x256xbf16, #tpu.memory_space<vmem>>, %arg2: memref<256x128xbf16, #tpu.memory_space<vmem>>, %arg3: memref<256x128xbf16, #tpu.memory_space<vmem>>, %arg4: memref<8x128xf32, #tpu.memory_space<vmem>>, %arg5: memref<8x128xf32, #tpu.memory_space<vmem>>) attributes {dimension_semantics = [], scalar_prefetch = 0 : i64, scratch_operands = 0 : i64, tpu.core_type = #tpu.core_type<tc>} {
    %c0 = arith.constant 0 : index
    %c0_0 = arith.constant 0 : index
    %0 = vector.load %arg0[%c0, %c0_0] : memref<8x256xbf16, #tpu.memory_space<vmem>>, vector<8x256xbf16>
    %c0_1 = arith.constant 0 : index
    %c0_2 = arith.constant 0 : index
    %1 = vector.load %arg1[%c0_1, %c0_2] : memref<8x256xbf16, #tpu.memory_space<vmem>>, vector<8x256xbf16>
    %c0_3 = arith.constant 0 : index
    %c0_4 = arith.constant 0 : index
    %2 = vector.load %arg2[%c0_3, %c0_4] : memref<256x128xbf16, #tpu.memory_space<vmem>>, vector<256x128xbf16>
    %c0_5 = arith.constant 0 : index
    %c0_6 = arith.constant 0 : index
    %3 = vector.load %arg3[%c0_5, %c0_6] : memref<256x128xbf16, #tpu.memory_space<vmem>>, vector<256x128xbf16>
    %cst = arith.constant dense<0.000000e+00> : vector<8x128xf32>
    %4 = tpu.matmul %0, %2, %cst {dimension_numbers = #tpu.dot_dimension_numbers<[1], [0], [0], [1], [0, 0, 1, 1], [], []>} : vector<8x256xbf16>, vector<256x128xbf16>, vector<8x128xf32> -> vector<8x128xf32>
    %cst_7 = arith.constant dense<0.000000e+00> : vector<8x128xf32>
    %5 = tpu.matmul %1, %3, %cst_7 {dimension_numbers = #tpu.dot_dimension_numbers<[1], [0], [0], [1], [0, 0, 1, 1], [], []>} : vector<8x256xbf16>, vector<256x128xbf16>, vector<8x128xf32> -> vector<8x128xf32>
    %cst_8 = arith.constant dense<0.000000e+00> : vector<8x128xf32>
    %6 = tpu.matmul %0, %3, %cst_8 {dimension_numbers = #tpu.dot_dimension_numbers<[1], [0], [0], [1], [0, 0, 1, 1], [], []>} : vector<8x256xbf16>, vector<256x128xbf16>, vector<8x128xf32> -> vector<8x128xf32>
    %cst_9 = arith.constant dense<0.000000e+00> : vector<8x128xf32>
    %7 = tpu.matmul %1, %2, %cst_9 {dimension_numbers = #tpu.dot_dimension_numbers<[1], [0], [0], [1], [0, 0, 1, 1], [], []>} : vector<8x256xbf16>, vector<256x128xbf16>, vector<8x128xf32> -> vector<8x128xf32>
    %8 = arith.subf %4, %5 : vector<8x128xf32>
    %c0_10 = arith.constant 0 : index
    %c0_11 = arith.constant 0 : index
    %9 = vector.load %arg4[%c0_10, %c0_11] : memref<8x128xf32, #tpu.memory_space<vmem>>, vector<8x128xf32>
    tpu.vector_store %arg4[%c0_10, %c0_11], %8 {strides = array<i32>} : memref<8x128xf32, #tpu.memory_space<vmem>>, vector<8x128xf32>,
    %10 = arith.addf %6, %7 : vector<8x128xf32>
    %c0_12 = arith.constant 0 : index
    %c0_13 = arith.constant 0 : index
    %11 = vector.load %arg5[%c0_12, %c0_13] : memref<8x128xf32, #tpu.memory_space<vmem>>, vector<8x128xf32>
    tpu.vector_store %arg5[%c0_12, %c0_13], %10 {strides = array<i32>} : memref<8x128xf32, #tpu.memory_space<vmem>>, vector<8x128xf32>,
    return
  }
}

</mosaic_0001>

<bundles_post_ra>
// kernel: learnable_fft.1
= control target key start
LH: loop header
LB: loop body
LE: loop exit
PB: predicated region body
PF: predicated region fallthrough
CT: control target
= control target key end

     0   :  { %s784_s2 = inlined_call_operand.vmem [shape: bf16[256,128], index: 2, kind: input, shape index: {}]   ;;  %s785_s3 = inlined_call_operand.vmem [shape: bf16[256,128], index: 3, kind: input, shape index: {}]   ;;  %s786_s1 = inlined_call_operand.vmem [shape: bf16[8,256], index: 1, kind: input, shape index: {}]   ;;  %s787_s0 = inlined_call_operand.vmem [shape: bf16[8,256], index: 0, kind: input, shape index: {}]   ;;  %s788_s4 = inlined_call_operand.vmem [shape: f32[8,128], index: 4, kind: output, shape index: {0}]   ;;  %s789_s5 = inlined_call_operand.vmem [shape: f32[8,128], index: 5, kind: output, shape index: {1}]  }
   0x1   :  { %v599_v0 = vld [vmem:[%s784_s2 + $0x38] sm:$0xff]  ;;  %v621_v4 = vld [vmem:[%s784_s2 + $0x30] sm:$0xff]  ;;  %v645_v8 = vld [vmem:[%s784_s2 + $0x28] sm:$0xff] }
   0x2   :  { %v604_v1 = vld [vmem:[%s784_s2 + $0x78] sm:$0xff]  ;;  %188 = vmatpush.bf16.msra.mxu0 %v599_v0  ;;  %v626_v5 = vld [vmem:[%s784_s2 + $0x70] sm:$0xff]  ;;  %v650_v9 = vld [vmem:[%s784_s2 + $0x68] sm:$0xff] }
   0x3   :  { %v609_v2 = vld [vmem:[%s785_s3 + $0x38] sm:$0xff]  ;;  %201 = vmatpush.bf16.msra.mxu1 %v604_v1  ;;  %v633_v6 = vld [vmem:[%s785_s3 + $0x30] sm:$0xff]  ;;  %v657_v10 = vld [vmem:[%s785_s3 + $0x28] sm:$0xff] }
   0x4   :  { %v614_v3 = vld [vmem:[%s785_s3 + $0x78] sm:$0xff]  ;;  %317 = vmatpush.bf16.msra.mxu2 %v609_v2  ;;  %v638_v7 = vld [vmem:[%s785_s3 + $0x70] sm:$0xff]  ;;  %v662_v11 = vld [vmem:[%s785_s3 + $0x68] sm:$0xff] }
   0x5   :  { %330 = vmatpush.bf16.msra.mxu3 %v614_v3  ;;  %v669_v12 = vld [vmem:[%s784_s2 + $0x20] sm:$0xff]  ;;  %v693_v16 = vld [vmem:[%s784_s2 + $0x18] sm:$0xff]  ;;  %v536_v20 = vld [vmem:[%s784_s2 + $0x10] sm:$0xff] }
   0x6   :  { %189 = vmatpush.bf16.msra.mxu0 %v621_v4  ;;  %v674_v13 = vld [vmem:[%s784_s2 + $0x60] sm:$0xff]  ;;  %v698_v17 = vld [vmem:[%s784_s2 + $0x58] sm:$0xff]  ;;  %v544_v21 = vld [vmem:[%s784_s2 + $0x50] sm:$0xff] }
   0x7   :  { %202 = vmatpush.bf16.msra.mxu1 %v626_v5  ;;  %v681_v14 = vld [vmem:[%s785_s3 + $0x20] sm:$0xff]  ;;  %v705_v18 = vld [vmem:[%s785_s3 + $0x18] sm:$0xff]  ;;  %v552_v22 = vld [vmem:[%s785_s3 + $0x10] sm:$0xff] }
   0x8   :  { %318 = vmatpush.bf16.msra.mxu2 %v633_v6  ;;  %v686_v15 = vld [vmem:[%s785_s3 + $0x60] sm:$0xff]  ;;  %v710_v19 = vld [vmem:[%s785_s3 + $0x58] sm:$0xff]  ;;  %v560_v23 = vld [vmem:[%s785_s3 + $0x50] sm:$0xff] }
   0x9   :  { %331 = vmatpush.bf16.msra.mxu3 %v638_v7  ;;  %v535_v24 = vld [vmem:[%s784_s2 + $0x8] sm:$0xff]  ;;  %v20_v28 = vld [vmem:[%s786_s1] sm:$0xff] }
   0xa   :  { %190 = vmatpush.bf16.msra.mxu0 %v645_v8  ;;  %v543_v25 = vld [vmem:[%s784_s2 + $0x48] sm:$0xff]  ;;  %v19_v29 = vld [vmem:[%s787_s0] sm:$0xff]  ;;  %v215_v32 = vunpack.c.l.b16 %v20_v28  ;;  %v216_v33 = vunpack.c.h.b16 %v20_v28 }
   0xb   :  { %203 = vmatpush.bf16.msra.mxu1 %v650_v9  ;;  %v551_v26 = vld [vmem:[%s785_s3 + $0x8] sm:$0xff]  ;;  %v534_v30 = vld [vmem:[%s784_s2] sm:$0xff]  ;;  %v86_v36 = vunpack.c.l.b16 %v19_v29  ;;  %v87_v37 = vunpack.c.h.b16 %v19_v29 }
   0xc   :  { %319 = vmatpush.bf16.msra.mxu2 %v657_v10  ;;  %v559_v27 = vld [vmem:[%s785_s3 + $0x48] sm:$0xff]  ;;  %v542_v31 = vld [vmem:[%s784_s2 + $0x40] sm:$0xff]  ;;  %v217_v38 = vpack.c.b16 %v215_v32, %v215_v32  ;;  %v218_v39 = vpack.c.b16 %v216_v33, %v216_v33 }
   0xd   :  { %332 = vmatpush.bf16.msra.mxu3 %v662_v11  ;;  %v550_v34 = vld [vmem:[%s785_s3] sm:$0xff]  ;;  %v88_v40 = vpack.c.b16 %v86_v36, %v86_v36  ;;  %v89_v41 = vpack.c.b16 %v87_v37, %v87_v37 }
   0xe   :  { %191 = vmatpush.bf16.msra.mxu0 %v669_v12  ;;  %v558_v35 = vld [vmem:[%s785_s3 + $0x40] sm:$0xff] }
   0xf   :  { %204 = vmatpush.bf16.msra.mxu1 %v674_v13 }
  0x10   :  { %320 = vmatpush.bf16.msra.mxu2 %v681_v14 }
  0x11   :  { %333 = vmatpush.bf16.msra.mxu3 %v686_v15 }
  0x12   :  { %192 = vmatpush.bf16.msra.mxu0 %v693_v16 }
  0x13   :  { %205 = vmatpush.bf16.msra.mxu1 %v698_v17 }
  0x14   :  { %321 = vmatpush.bf16.msra.mxu2 %v705_v18 }
  0x15   :  { %334 = vmatpush.bf16.msra.mxu3 %v710_v19 }
  0x16   :  { %193 = vmatpush.bf16.msra.mxu0 %v536_v20 }
  0x17   :  { %206 = vmatpush.bf16.msra.mxu1 %v544_v21 }
  0x18   :  { %322 = vmatpush.bf16.msra.mxu2 %v552_v22 }
  0x19   :  { %335 = vmatpush.bf16.msra.mxu3 %v560_v23 }
  0x1a   :  { %194 = vmatpush.bf16.msra.mxu0 %v535_v24 }
  0x1b   :  { %207 = vmatpush.bf16.msra.mxu1 %v543_v25 }
  0x1c   :  { %323 = vmatpush.bf16.msra.mxu2 %v551_v26 }
  0x1d   :  { %336 = vmatpush.bf16.msra.mxu3 %v559_v27 }
  0x1e   :  { %195 = vmatpush.bf16.msra.mxu0 %v534_v30 }
  0x1f   :  { %208 = vmatpush.bf16.msra.mxu1 %v542_v31 }
  0x20   :  { %324 = vmatpush.bf16.msra.mxu2 %v550_v34 }
  0x21   :  { %337 = vmatpush.bf16.msra.mxu3 %v558_v35  ;;  %196 = vmatmul.bf16.vlgmr.msra.gmra.mxu0 %v88_v40 }
  0x22   :  { %343 = vmatpush.bf16.msrb.mxu0 %v599_v0  ;;  %209 = vmatmul.bf16.vlgmr.msra.gmra.mxu1 %v89_v41 }
  0x23   :  { %356 = vmatpush.bf16.msrb.mxu1 %v604_v1  ;;  %325 = vmatmul.bf16.vlgmr.msra.gmra.mxu2 %v217_v38 }
  0x24   :  { %371 = vmatpush.bf16.msrb.mxu2 %v609_v2  ;;  %338 = vmatmul.bf16.vlgmr.msra.gmra.mxu3 %v218_v39 }
  0x25   :  { %384 = vmatpush.bf16.msrb.mxu3 %v614_v3 }
  0x26   :  { %344 = vmatpush.bf16.msrb.mxu0 %v621_v4 }
  0x27   :  { %357 = vmatpush.bf16.msrb.mxu1 %v626_v5 }
  0x28   :  { %372 = vmatpush.bf16.msrb.mxu2 %v633_v6 }
  0x29   :  { %385 = vmatpush.bf16.msrb.mxu3 %v638_v7 }
  0x2a   :  { %345 = vmatpush.bf16.msrb.mxu0 %v645_v8 }
  0x2b   :  { %358 = vmatpush.bf16.msrb.mxu1 %v650_v9 }
  0x2c   :  { %373 = vmatpush.bf16.msrb.mxu2 %v657_v10 }
  0x2d   :  { %386 = vmatpush.bf16.msrb.mxu3 %v662_v11 }
  0x2e   :  { %346 = vmatpush.bf16.msrb.mxu0 %v669_v12 }
  0x2f   :  { %359 = vmatpush.bf16.msrb.mxu1 %v674_v13 }
  0x30   :  { %374 = vmatpush.bf16.msrb.mxu2 %v681_v14 }
  0x31   :  { %387 = vmatpush.bf16.msrb.mxu3 %v686_v15 }
  0x32   :  { %347 = vmatpush.bf16.msrb.mxu0 %v693_v16 }
  0x33   :  { %360 = vmatpush.bf16.msrb.mxu1 %v698_v17 }
  0x34   :  { %375 = vmatpush.bf16.msrb.mxu2 %v705_v18 }
  0x35   :  { %388 = vmatpush.bf16.msrb.mxu3 %v710_v19 }
  0x36   :  { %348 = vmatpush.bf16.msrb.mxu0 %v536_v20 }
  0x37   :  { %361 = vmatpush.bf16.msrb.mxu1 %v544_v21 }
  0x38   :  { %376 = vmatpush.bf16.msrb.mxu2 %v552_v22 }
  0x39   :  { %389 = vmatpush.bf16.msrb.mxu3 %v560_v23 }
  0x3a   :  { %349 = vmatpush.bf16.msrb.mxu0 %v535_v24 }
  0x3b   :  { %362 = vmatpush.bf16.msrb.mxu1 %v543_v25 }
  0x3c   :  { %377 = vmatpush.bf16.msrb.mxu2 %v551_v26 }
  0x3d   :  { %390 = vmatpush.bf16.msrb.mxu3 %v559_v27 }
  0x3e   :  { %350 = vmatpush.bf16.msrb.mxu0 %v534_v30 }
  0x3f   :  { %363 = vmatpush.bf16.msrb.mxu1 %v542_v31 }
  0x40   :  { %378 = vmatpush.bf16.msrb.mxu2 %v550_v34 }
  0x41   :  { %391 = vmatpush.bf16.msrb.mxu3 %v558_v35  ;;  %351 = vmatmul.bf16.vlgmr.msrb.gmra.mxu0 %v217_v38 }
  0x42   :  { %364 = vmatmul.bf16.vlgmr.msrb.gmra.mxu1 %v218_v39 }
  0x43   :  { %379 = vmatmul.bf16.vlgmr.msrb.gmra.mxu2 %v88_v40 }
  0x44   :  { %392 = vmatmul.bf16.vlgmr.msrb.gmra.mxu3 %v89_v41 }
  0x9e   :  { %v197_v42 = vpop.f32.mrf.mxu0 }
  0x9f   :  { %v210_v43 = vpop.f32.mrf.mxu1 }
  0xa0   :  { %v211_v44 = vadd.f32 %v210_v43, %v197_v42 }
  0xa6   :  { %v326_v45 = vpop.f32.mrf.mxu2  ;;  %v199_v49 = vpop.f32.mrf.mxu0 }
  0xa7   :  { %v339_v46 = vpop.f32.mrf.mxu3  ;;  %v212_v50 = vpop.f32.mrf.mxu1 }
  0xa8   :  { %v340_v47 = vadd.f32 %v339_v46, %v326_v45 }
  0xaa   :  { %v369_v48 = vsub.f32 %v211_v44, %v340_v47 }
  0xac   :  { %370 = vst [vmem:[%s788_s4] sm:$0xff] %v369_v48 }
  0xae   :  { %v328_v51 = vpop.f32.mrf.mxu2 }
  0xaf   :  { %v341_v52 = vpop.f32.mrf.mxu3 }
  0xbe   :  { %v352_v53 = vpop.f32.mrf.mxu0 }
  0xbf   :  { %v365_v54 = vpop.f32.mrf.mxu1 }
  0xc0   :  { %v366_v55 = vadd.f32 %v365_v54, %v352_v53 }
  0xc6   :  { %v380_v56 = vpop.f32.mrf.mxu2  ;;  %v354_v59 = vpop.f32.mrf.mxu0 }
  0xc7   :  { %v393_v57 = vpop.f32.mrf.mxu3  ;;  %v381_v58 = vadd.f32 %v380_v56, %v366_v55  ;;  %v367_v60 = vpop.f32.mrf.mxu1 }
  0xc9   :  { %v394_v61 = vadd.f32 %v393_v57, %v381_v58 }
  0xcb   :  { %397 = vst [vmem:[%s789_s5] sm:$0xff] %v394_v61 }
  0xce   :  { %v382_v62 = vpop.f32.mrf.mxu2 }
  0xcf   :  { %v395_v63 = vpop.f32.mrf.mxu3 }

</bundles_post_ra>
